<compile_context>
chip_gen: v7x
topology: tpu7x:2x2x1
jax: 0.10.0
libtpu: 0.0.40
codegen_flags: <defaults>
</compile_context>

<pallas_src>
import math

import jax
import jax.numpy as jnp
from jax.experimental import pallas as pl
from jax.experimental.pallas import tpu as pltpu


def _attn_kernel(vl_ref, q_ref, k_ref, v_ref, o_ref, w_ref=None):
    q = q_ref[0]          # (tq, D)
    k = k_ref[0]          # (K, D)
    v = v_ref[0]          # (K, V)
    vlen = vl_ref[0]      # (tq, 1) int32 per-row valid length

    d = q.shape[-1]
    # Fold 1/sqrt(d) into Q: tq*D multiplies instead of tq*K.
    q_scaled = q * jnp.asarray(1.0 / math.sqrt(d), dtype=q.dtype)

    # scores = Q @ K^T without materializing the transpose: contract dim 1 of
    # both operands so the MXU consumes K in its native (K, D) layout.
    scores = jax.lax.dot_general(
        q_scaled, k,
        dimension_numbers=(((1,), (1,)), ((), ())),
        preferred_element_type=jnp.float32)                       # (tq, K)

    # Masked softmax over the last axis (same -1e6 fill as utils.sequence_mask).
    col = jax.lax.broadcasted_iota(jnp.int32, scores.shape, 1)
    scores = jnp.where(col < vlen, scores, jnp.float32(-1000000.0))

    m = jnp.max(scores, axis=-1, keepdims=True)
    e = jnp.exp(scores - m)
    denom = jnp.sum(e, axis=-1, keepdims=True)
    # approx=True lowers to the EUP vrcp slot (otherwise idle during softmax).
    w = e * pl.reciprocal(denom, approx=True)                     # (tq, K)

    if w_ref is not None:
        w_ref[0] = w.astype(w_ref.dtype)
    o_ref[0] = jnp.dot(w.astype(v.dtype), v,
                       preferred_element_type=jnp.float32).astype(o_ref.dtype)


def _pick_q_tile(Q):
    # Largest Q tile (<=256, multiple of 8) that evenly divides Q; else full Q.
    for cand in (256, 128, 64, 32, 16, 8):
        if Q >= cand and Q % cand == 0:
            return cand
    return Q


def dot_product_attention(queries, keys, values, valid_lens=None,
                          return_weights=True):
    """queries (B,Q,D), keys (B,K,D), values (B,K,V).

    valid_lens: None, (B,) int, or (B,Q) int.
    Returns output (B,Q,V) [, attention_weights (B,Q,K) if return_weights].
    """
    B, Q, D = queries.shape
    _, K, _ = keys.shape
    V = values.shape[-1]

    # Normalize valid_lens -> (B, Q, 1) int32 (per-row), matching both the
    # 1-D (per-batch, repeat_interleave) and 2-D (per-row) reference paths.
    if valid_lens is None:
        vl = jnp.full((B, Q, 1), K, dtype=jnp.int32)
    else:
        vl = valid_lens.astype(jnp.int32)
        if vl.ndim == 1:
            vl = jnp.broadcast_to(vl[:, None], (B, Q))
        vl = vl.reshape(B, Q, 1)

    tq = _pick_q_tile(Q)
    grid = (B, Q // tq)

    in_specs = [
        pl.BlockSpec((1, tq, 1), lambda b, i: (b, i, 0)),   # per-row valid len
        pl.BlockSpec((1, tq, D), lambda b, i: (b, i, 0)),   # Q tile
        pl.BlockSpec((1, K, D), lambda b, i: (b, 0, 0)),    # K resident across Q
        pl.BlockSpec((1, K, V), lambda b, i: (b, 0, 0)),    # V resident across Q
    ]
    o_spec = pl.BlockSpec((1, tq, V), lambda b, i: (b, i, 0))

    if return_weights:
        out_specs = [o_spec, pl.BlockSpec((1, tq, K), lambda b, i: (b, i, 0))]
        out_shape = (jax.ShapeDtypeStruct((B, Q, V), queries.dtype),
                     jax.ShapeDtypeStruct((B, Q, K), queries.dtype))
    else:
        out_specs = o_spec
        out_shape = jax.ShapeDtypeStruct((B, Q, V), queries.dtype)

    grid_spec = pltpu.PrefetchScalarGridSpec(
        num_scalar_prefetch=0,
        grid=grid,
        in_specs=in_specs,
        out_specs=out_specs,
    )

    result = pl.pallas_call(
        _attn_kernel,
        out_shape=out_shape,
        grid_spec=grid_spec,
        compiler_params=pltpu.CompilerParams(
            dimension_semantics=("parallel", "parallel")),
    )(vl, queries, keys, values)

    if return_weights:
        out, attn_w = result
        return out, attn_w
    return result


def _reference(queries, keys, values, valid_lens):
    d = queries.shape[-1]
    scores = jnp.einsum("bqd,bkd->bqk", queries, keys) / math.sqrt(d)
    if valid_lens is not None:
        col = jnp.arange(scores.shape[-1])[None, None, :]
        if valid_lens.ndim == 1:
            mask = col < valid_lens[:, None, None]
        else:
            mask = col < valid_lens[:, :, None]
        scores = jnp.where(mask, scores, -1000000.0)
    w = jax.nn.softmax(scores, axis=-1)
    return jnp.einsum("bqk,bkv->bqv", w, values), w


if __name__ == "__main__":
    key = jax.random.PRNGKey(0)
    B, Q, K, D, V = 2, 8, 8, 32, 32

    kq, kk, kv = jax.random.split(key, 3)
    queries = jax.random.normal(kq, (B, Q, D), dtype=jnp.float32)
    keys = jax.random.normal(kk, (B, K, D), dtype=jnp.float32)
    values = jax.random.normal(kv, (B, K, V), dtype=jnp.float32)
    valid_lens = jnp.array([3, 8], dtype=jnp.int32)

    out, attn_w = dot_product_attention(queries, keys, values, valid_lens)
    out = jax.block_until_ready(out)
    attn_w = jax.block_until_ready(attn_w)

    ref_out, ref_w = _reference(queries, keys, values, valid_lens)
    # Tolerances absorb the EUP approximate-reciprocal softmax denominator.
    assert jnp.allclose(out, ref_out, atol=2e-3, rtol=2e-3), "output mismatch"
    assert jnp.allclose(attn_w, ref_w, atol=2e-3, rtol=2e-3), "weights mismatch"

    # Output-only path (no attention-weights write-back).
    out_only = jax.block_until_ready(
        dot_product_attention(queries, keys, values, valid_lens,
                              return_weights=False))
    assert jnp.allclose(out_only, ref_out, atol=2e-3, rtol=2e-3), \
        "output-only mismatch"

    # No-mask path.
    out_nm, w_nm = dot_product_attention(queries, keys, values, None)
    out_nm = jax.block_until_ready(out_nm)
    ref_out_nm, _ = _reference(queries, keys, values, None)
    assert jnp.allclose(out_nm, ref_out_nm, atol=2e-3, rtol=2e-3), \
        "no-mask mismatch"

    print("KERNEL_OK")
</pallas_src>

<mosaic_0001>
module attributes {stable_mosaic.version = 11 : i64} {
  func.func @_attn_kernel(%arg0: i32, %arg1: i32, %arg2: memref<1x8x1xi32, #tpu.memory_space<vmem>>, %arg3: memref<1x8x32xf32, #tpu.memory_space<vmem>>, %arg4: memref<1x8x32xf32, #tpu.memory_space<vmem>>, %arg5: memref<1x8x32xf32, #tpu.memory_space<vmem>>, %arg6: memref<1x8x32xf32, #tpu.memory_space<vmem>>, %arg7: memref<1x8x8xf32, #tpu.memory_space<vmem>>) attributes {dimension_semantics = [#tpu.dimension_semantics<parallel>, #tpu.dimension_semantics<parallel>], iteration_bounds = array<i64: 2, 1>, scalar_prefetch = 0 : i64, scratch_operands = 0 : i64, tpu.core_type = #tpu.core_type<tc>, window_params = [{transform_indices = @transform_0, window_bounds = array<i64: 1, 8, 1>}, {transform_indices = @transform_1, window_bounds = array<i64: 1, 8, 32>}, {transform_indices = @transform_2, window_bounds = array<i64: 1, 8, 32>}, {transform_indices = @transform_3, window_bounds = array<i64: 1, 8, 32>}, {transform_indices = @transform_4, window_bounds = array<i64: 1, 8, 32>}, {transform_indices = @transform_5, window_bounds = array<i64: 1, 8, 8>}]} {
    %c0 = arith.constant 0 : index
    %c0_0 = arith.constant 0 : index
    %c0_1 = arith.constant 0 : index
    %0 = vector.load %arg3[%c0, %c0_0, %c0_1] : memref<1x8x32xf32, #tpu.memory_space<vmem>>, vector<1x8x32xf32>
    %1 = vector.shape_cast %0 : vector<1x8x32xf32> to vector<8x32xf32>
    %c0_2 = arith.constant 0 : index
    %c0_3 = arith.constant 0 : index
    %c0_4 = arith.constant 0 : index
    %2 = vector.load %arg4[%c0_2, %c0_3, %c0_4] : memref<1x8x32xf32, #tpu.memory_space<vmem>>, vector<1x8x32xf32>
    %3 = vector.shape_cast %2 : vector<1x8x32xf32> to vector<8x32xf32>
    %c0_5 = arith.constant 0 : index
    %c0_6 = arith.constant 0 : index
    %c0_7 = arith.constant 0 : index
    %4 = vector.load %arg5[%c0_5, %c0_6, %c0_7] : memref<1x8x32xf32, #tpu.memory_space<vmem>>, vector<1x8x32xf32>
    %5 = vector.shape_cast %4 : vector<1x8x32xf32> to vector<8x32xf32>
    %c0_8 = arith.constant 0 : index
    %c0_9 = arith.constant 0 : index
    %c0_10 = arith.constant 0 : index
    %6 = vector.load %arg2[%c0_8, %c0_9, %c0_10] : memref<1x8x1xi32, #tpu.memory_space<vmem>>, vector<1x8x1xi32>
    %7 = vector.shape_cast %6 : vector<1x8x1xi32> to vector<8x1xi32>
    %cst = arith.constant 0.176776692 : f32
    %8 = vector.broadcast %cst : f32 to vector<8x32xf32>
    %9 = arith.mulf %1, %8 : vector<8x32xf32>
    %cst_11 = arith.constant dense<0.000000e+00> : vector<8x8xf32>
    %10 = tpu.matmul %9, %3, %cst_11 {dimension_numbers = #tpu.dot_dimension_numbers<[1], [1], [0], [0], [0, 0, 1, 0], [], []>} : vector<8x32xf32>, vector<8x32xf32>, vector<8x8xf32> -> vector<8x8xf32>
    %11 = tpu.iota {dimensions = array<i32: 1>} : vector<8x8xi32>
    %12 = vector.broadcast %7 : vector<8x1xi32> to vector<8x8xi32>
    %13 = arith.cmpi slt, %11, %12 : vector<8x8xi32>
    %cst_12 = arith.constant -1.000000e+06 : f32
    %14 = vector.broadcast %cst_12 : f32 to vector<8x8xf32>
    %15 = arith.select %13, %10, %14 : vector<8x8xi1>, vector<8x8xf32>
    %cst_13 = arith.constant dense<0xFF800000> : vector<8xf32>
    %16 = vector.multi_reduction <maximumf>, %15, %cst_13 [1] : vector<8x8xf32> to vector<8xf32>
    %17 = vector.shape_cast %16 : vector<8xf32> to vector<8x1xf32>
    %18 = vector.broadcast %17 : vector<8x1xf32> to vector<8x8xf32>
    %19 = arith.subf %15, %18 : vector<8x8xf32>
    %20 = math.exp %19 : vector<8x8xf32>
    %cst_14 = arith.constant dense<0.000000e+00> : vector<8xf32>
    %21 = vector.multi_reduction <add>, %20, %cst_14 [1] : vector<8x8xf32> to vector<8xf32>
    %22 = vector.shape_cast %21 : vector<8xf32> to vector<8x1xf32>
    %23 = tpu.reciprocal %22 {approx = true} : vector<8x1xf32> -> vector<8x1xf32>
    %24 = vector.broadcast %23 : vector<8x1xf32> to vector<8x8xf32>
    %25 = arith.mulf %20, %24 : vector<8x8xf32>
    %c0_15 = arith.constant 0 : index
    %c0_16 = arith.constant 0 : index
    %c0_17 = arith.constant 0 : index
    %26 = vector.load %arg7[%c0_15, %c0_16, %c0_17] : memref<1x8x8xf32, #tpu.memory_space<vmem>>, vector<1x8x8xf32>
    %27 = vector.shape_cast %26 : vector<1x8x8xf32> to vector<8x8xf32>
    %28 = vector.shape_cast %25 : vector<8x8xf32> to vector<1x8x8xf32>
    tpu.vector_store %arg7[%c0_15, %c0_16, %c0_17], %28 {strides = array<i32>} : memref<1x8x8xf32, #tpu.memory_space<vmem>>, vector<1x8x8xf32>,
    %cst_18 = arith.constant dense<0.000000e+00> : vector<8x32xf32>
    %29 = tpu.matmul %25, %5, %cst_18 {dimension_numbers = #tpu.dot_dimension_numbers<[1], [0], [0], [1], [0, 0, 1, 1], [], []>} : vector<8x8xf32>, vector<8x32xf32>, vector<8x32xf32> -> vector<8x32xf32>
    %c0_19 = arith.constant 0 : index
    %c0_20 = arith.constant 0 : index
    %c0_21 = arith.constant 0 : index
    %30 = vector.load %arg6[%c0_19, %c0_20, %c0_21] : memref<1x8x32xf32, #tpu.memory_space<vmem>>, vector<1x8x32xf32>
    %31 = vector.shape_cast %30 : vector<1x8x32xf32> to vector<8x32xf32>
    %32 = vector.shape_cast %29 : vector<8x32xf32> to vector<1x8x32xf32>
    tpu.vector_store %arg6[%c0_19, %c0_20, %c0_21], %32 {strides = array<i32>} : memref<1x8x32xf32, #tpu.memory_space<vmem>>, vector<1x8x32xf32>,
    return
  }
  func.func @transform_0(%arg0: i32, %arg1: i32) -> (i32, i32, i32) {
    %c0_i32 = arith.constant 0 : i32
    %c0_i32_0 = arith.constant 0 : i32
    return %arg0, %arg1, %c0_i32 : i32, i32, i32
  }
  func.func @transform_1(%arg0: i32, %arg1: i32) -> (i32, i32, i32) {
    %c0_i32 = arith.constant 0 : i32
    %c0_i32_0 = arith.constant 0 : i32
    return %arg0, %arg1, %c0_i32 : i32, i32, i32
  }
  func.func @transform_2(%arg0: i32, %arg1: i32) -> (i32, i32, i32) {
    %c0_i32 = arith.constant 0 : i32
    %c0_i32_0 = arith.constant 0 : i32
    %c0_i32_1 = arith.constant 0 : i32
    return %arg0, %c0_i32, %c0_i32_0 : i32, i32, i32
  }
  func.func @transform_3(%arg0: i32, %arg1: i32) -> (i32, i32, i32) {
    %c0_i32 = arith.constant 0 : i32
    %c0_i32_0 = arith.constant 0 : i32
    %c0_i32_1 = arith.constant 0 : i32
    return %arg0, %c0_i32, %c0_i32_0 : i32, i32, i32
  }
  func.func @transform_4(%arg0: i32, %arg1: i32) -> (i32, i32, i32) {
    %c0_i32 = arith.constant 0 : i32
    %c0_i32_0 = arith.constant 0 : i32
    return %arg0, %arg1, %c0_i32 : i32, i32, i32
  }
  func.func @transform_5(%arg0: i32, %arg1: i32) -> (i32, i32, i32) {
    %c0_i32 = arith.constant 0 : i32
    %c0_i32_0 = arith.constant 0 : i32
    return %arg0, %arg1, %c0_i32 : i32, i32, i32
  }
}

</mosaic_0001>

<bundles_post_ra>
// kernel: tpu_custom_call.1
= control target key start
LH: loop header
LB: loop body
LE: loop exit
PB: predicated region body
PF: predicated region fallthrough
CT: control target
= control target key end

     0   :  { %11 = vsyncpa [#allocation3], 0  ;;  %s1340_s0 = inlined_call_operand.vmem [shape: s32[2,8,1], index: 0, kind: input, shape index: {}]   ;;  %s1341_s1 = inlined_call_operand.vmem [shape: f32[2,8,32], index: 1, kind: input, shape index: {}]   ;;  %s1342_s2 = inlined_call_operand.hbm [shape: f32[2,8,32], index: 2, kind: input, shape index: {}]   ;;  %s1343_s3 = inlined_call_operand.hbm [shape: f32[2,8,32], index: 3, kind: input, shape index: {}]   ;;  %s1344_s4 = inlined_call_operand.hbm [shape: f32[2,8,32], index: 4, kind: output, shape index: {0}]   ;;  %s1345_s5 = inlined_call_operand.hbm [shape: f32[2,8,8], index: 5, kind: output, shape index: {1}]  }
   0x1   :  { %13 = vsyncpa [#allocation3 + $0x1], 0 }
   0x2   :  { %14 = vsyncpa [#allocation6], 0 }
   0x3   :  { %16 = vsyncpa [#allocation6 + $0x1], 0 }
   0x4   :  { %17 = vsyncpa [#allocation4], 0 }
   0x5   :  { %19 = vsyncpa [#allocation4 + $0x1], 0 }
   0x6   :  { %20 = vsyncpa [#allocation9], 0 }
   0x7   :  { %22 = vsyncpa [#allocation9 + $0x1], 0  ;;  %s1070_s18 = smov 0   ;;  %s1072_s19 = smov 0  }
   0x8   :  { %s1074_s20 = smov 0   ;;  %s1076_s21 = smov 0  }
   0x9   :  { %s1078_s22 = smov 0   ;;  %s1080_s23 = smov 0  }
   0xa LB: > { %s735_s24 = sadd.s32 4294967295, %s1031_s23   ;;  %s736_s25 = sadd.s32 4294967294, %s1031_s23   ;;  %s1031_s23 = sphi %s1080_s23, %s28_s23   ;;  %s1027_s22 = sphi %s1078_s22, %s1365_s22   ;;  %s1023_s21 = sphi %s1076_s21, %s1364_s21   ;;  %s1019_s20 = sphi %s1074_s20, %s1363_s20   ;;  %s1015_s19 = sphi %s1072_s19, %s1362_s19   ;;  %s1011_s18 = sphi %s1070_s18, %s1361_s18  }
   0xb   : > { %s40_s26 = sadd.s32 1, %s1027_s22  ;;  %s103_s27 = sadd.s32 1, %s1019_s20 }
   0xc   : > { %p42_p0 = scmp.ge.s32.totalorder %s40_s26, 2  ;;  %p110_p1 = scmp.ne.s32.totalorder %s1019_s20, %s1015_s19 }
   0xd   : > { %p111_p2 = scmp.eq.s32.totalorder %s1031_s23, 0  ;;  %p116_p3 = scmp.ne.s32.totalorder %s1015_s19, %s1011_s18 }
   0xe   : > { %s1367_s26 = smov (%p42_p0, %s40_s26), 0  ;;  %p117_p5 = scmp.eq.s32.totalorder %s735_s24, 0 }
   0xf   : > { %p1111_p4 = por %p111_p2, %p110_p1  ;;  %s100_s29 = ssub.s32 %s1027_s22, %s1367_s26 }
  0x10   : > { %p168_p6 = scmp.eq.s32.totalorder %s735_s24, 1  ;;  %p101_p7 = scmp.eq.s32.totalorder %s100_s29, 0 }
  0x11   : > { %p1117_p8 = por %p117_p5, %p116_p3  ;;  %p174_p10 = scmp.eq.s32.totalorder %s736_s25, 1 }
  0x12   : > { %p1121_p9 = por %p168_p6, %p110_p1  ;;  %p795_p13 = scmp.lt.s32.totalorder %s1031_s23, 2 }
  0x13   : > { %s1349_s30 = scalar_select %p1117_p8, 1, 0 }
  0x14   : > { %s1350_s6 = scalar_select %p1121_p9, 1, 0 }
  0x15   : > { %s1126_s7 = scalar_select %p101_p7, %s1019_s20, %s103_s27  }
  0x16   : > { %p1128_p11 = por %p174_p10, %p116_p3  ;;  %s1135_s9 = sand.u32 1, %s1019_s20  }
  0x17   : > { %s739_s10 = sshll.u32 %s1135_s9, 3  ;;  %s740_s11 = sshll.u32 %s1027_s22, 7 }
  0x18   : > { %s1351_s8 = scalar_select %p1128_p11, 1, 0 }
  0x19   : > { %s1144_s14 = scalar_lea.hbm %s1342_s2, %s740_s11  ;;  %s246_s15 = scalar_lea.vmem [#allocation2], %s739_s10 }
  0x1a   : > { %s253_s16 = sshll.u32 %s246_s15, 4  ;;  %p1152_p0 = pnand %p795_p13, %p1111_p4  ;;  %s1148_s16 = int_to_ptr.vmem [resolvable:$true] %s253_s16 }
  0x1b   : > { %s243_s24 = scalar_lea.sflag [#allocation3], %s1135_s9  ;;  %s853_s25 = scalar_lea.hbm %s1144_s14, 128 }
  0x1c   : > { %p854_p3 = scmp.ne.s32.totalorder %s1144_s14, %s853_s25  ;;  %p855_p5 = pneg %p1152_p0 }
  0x1d   : > { %s858_s28 = scalar_lea.hbm %s1342_s2, 256  ;;  %p859_p4 = scmp.lt.u32.totalorder %s1144_s14, %s1342_s2 }
  0x1e   : > { %p856_p6 = pnand %p855_p5, %p854_p3  ;;  %p860_p10 = scmp.lt.u32.totalorder %s858_s28, %s853_s25 }
  0x1f   : > { %p862_p12 = scmp.lt.u32.totalorder %s853_s25, %s1144_s14 }
  0x20   : > { %p857_p7 = pneg %p856_p6  ;;  %p861_p13 = por %p860_p10, %p859_p4 }
  0x22   : > { %p863_p1 = por %p862_p12, %p861_p13 }
  0x24   : > { %p864_p2 = pnand %p863_p1, %p857_p7 }
  0x26   : > { %867 = shalt.err (!%p864_p2)
}
  0x27   : > { %s868_s15 = scalar_lea.vmem %s1148_s16, 128  ;;  %s1033_s27 = smov [#allocation2]  }
  0x28   : > { %p869_p3 = scmp.ne.s32.totalorder %s1148_s16, %s868_s15  ;;  %s873_s29 = sshll.u32 %s1033_s27, 4  ;;  %s874_s29 = int_to_ptr.vmem [resolvable:$false] %s873_s29 }
  0x29   : > { %s875_s12 = scalar_lea.vmem %s874_s29, 256  ;;  %p876_p9 = scmp.lt.s32.totalorder %s1148_s16, %s874_s29 }
  0x2a   : > { %p871_p6 = pnand %p869_p3, %p855_p5  ;;  %p877_p4 = scmp.lt.s32.totalorder %s875_s12, %s868_s15 }
  0x2c   : > { %p872_p11 = pneg %p871_p6  ;;  %p878_p10 = por %p877_p4, %p876_p9 }
  0x2e   : > { %p879_p12 = pnand %p878_p10, %p872_p11 }
  0x30   : > { %882 = shalt.err (!%p879_p12)
}
  0x31   : > { %784 = dma.hbm_to_vmem [thread:$0]  (!%p1152_p0), %s1144_s14, 128, %s1148_s16, %s243_s24  }
  0x32   : > { %p1353_p1 = scmp.lt.s32.totalorder %s1031_s23, 3  ;;  %p1354_p2 = scmp.ge.s32.totalorder %s1031_s23, 1 }
  0x33   : > { %s1197_s15 = scalar_lea.hbm %s1343_s3, %s740_s11  ;;  %s264_s27 = scalar_lea.vmem [#allocation5], %s739_s10 }
  0x34   : > { %p1188_p7 = pnand %p1354_p2, %p1353_p1  ;;  %s271_s29 = sshll.u32 %s264_s27, 4  ;;  %s272_s29 = int_to_ptr.vmem [resolvable:$true] %s271_s29 }
  0x35   : > { %s261_s14 = scalar_lea.sflag [#allocation6], %s1135_s9  ;;  %s883_s16 = scalar_lea.hbm %s1197_s15, 128 }
  0x36   : > { %s1355_s25 = scalar_select %p1188_p7, 1, 0 }
  0x37   : > { %p884_p9 = scmp.ne.s32.totalorder %s1197_s15, %s883_s16  ;;  %s888_s11 = scalar_lea.hbm %s1343_s3, 256 }
  0x38   : > { %p889_p3 = scmp.lt.u32.totalorder %s1197_s15, %s1343_s3  ;;  %p890_p6 = scmp.lt.u32.totalorder %s888_s11, %s883_s16 }
  0x39   : > { %p886_p11 = pnand %p884_p9, %p855_p5  ;;  %p892_p10 = scmp.lt.u32.totalorder %s883_s16, %s1197_s15 }
  0x3a   : > { %p891_p4 = por %p890_p6, %p889_p3 }
  0x3b   : > { %p887_p13 = pneg %p886_p11 }
  0x3c   : > { %p893_p12 = por %p892_p10, %p891_p4 }
  0x3e   : > { %p894_p1 = pnand %p893_p12, %p887_p13 }
  0x40   : > { %897 = shalt.err (!%p894_p1)
}
  0x41   : > { %s898_s9 = scalar_lea.vmem %s272_s29, 128  ;;  %s1034_s10 = smov [#allocation5]  }
  0x42   : > { %p899_p2 = scmp.ne.s32.totalorder %s272_s29, %s898_s9  ;;  %s903_s27 = sshll.u32 %s1034_s10, 4  ;;  %s904_s27 = int_to_ptr.vmem [resolvable:$false] %s903_s27 }
  0x43   : > { %s905_s24 = scalar_lea.vmem %s904_s27, 256  ;;  %p906_p8 = scmp.lt.s32.totalorder %s272_s29, %s904_s27 }
  0x44   : > { %p901_p9 = pnand %p899_p2, %p855_p5  ;;  %p907_p7 = scmp.lt.s32.totalorder %s905_s24, %s898_s9 }
  0x46   : > { %p902_p11 = pneg %p901_p9  ;;  %p908_p3 = por %p907_p7, %p906_p8 }
  0x48   : > { %p909_p6 = pnand %p908_p3, %p902_p11 }
  0x4a   : > { %912 = shalt.err (!%p909_p6)
}
  0x4b   : > { %787 = dma.hbm_to_vmem [thread:$0]  (!%p1152_p0), %s1197_s15, 128, %s272_s29, %s261_s14  }
  0x4c   : > { %p1356_p13 = scmp.ne.s32.totalorder %s1355_s25, 0 }
  0x4d   : > { %s1224_s16 = sand.u32 (!%p1356_p13), 1, %s1015_s19   ;;  %p1357_p8 = scmp.ne.s32.totalorder (!%p1356_p13), %s1349_s30, 0 }
  0x4e   : > { %280 = sbr.rel (%p1356_p13) target bundleno = 850 (0x352), region = 36  ;;  %s1227_s12 = sshll.u32 (!%p1356_p13), %s1224_s16, 3 }
  0x4f   : > { %s283_s11 = scalar_lea.sflag (!%p1356_p13), [#allocation3], %s1224_s16  ;;  %s286_s28 = scalar_lea.vmem (!%p1356_p13), [#allocation2], %s1227_s12 }
  0x55   : > { %994 = dma.done.wait (%p1357_p8), %s283_s11, 128  }
  0x56   : > { %996 = vsyncadd (%p1357_p8), %s283_s11, 4294967168  ;;  %s292_s17 = scalar_lea.sflag [#allocation6], %s1224_s16  ;;  %s295_s25 = scalar_lea.vmem [#allocation5], %s1227_s12 }
  0x57   : > { %998 = dma.done.wait (%p1357_p8), %s292_s17, 128  }
  0x58   : > { %1000 = vsyncadd (%p1357_p8), %s292_s17, 4294967168  ;;  %p346_p0 = scmp.lt.s32.totalorder %s1023_s21, 1  ;;  %v1035_v0 = vmov 0.0   ;;  %vm1036_vm0 = vmmov 0   ;;  %v1037_v1 = vmov 0   ;;  %vm365_vm1 = vcmask 261120  }
  0x59   : > { %763 = vmatprep.subr.mxu0 %v1035_v0  ;;  %765 = vmatprep.mubr.msk.f32.mxu0 %vm1036_vm0, %v1035_v0  ;;  %v361_v2 = vld [vmem:[%s286_s28] sm:$0xff]  ;;  %v442_v6 = vlaneseq  ;;  %vm449_vm3 = vcmask 64512   ;;  %v362_v18 = vld [vmem:[%s295_s25] sm:$0xff]  ;;  %s345_s24 = scalar_lea.vmem [#allocation8], %s1227_s12  ;;  %s755_s11 = sshll.u32 %s1023_s21, 7 }
  0x5a   : > { %s347_s15 = scalar_select %p346_p0, %s1023_s21, 1  ;;  %848 = vset.pattern.permute.xlu0 %v1037_v1  ;;  %768 = vmatprep.subr.mxu1 %v1035_v0 }
  0x5b   : > { %770 = vmatprep.mubr.msk.f32.mxu1 %vm1036_vm0, %v1035_v0  ;;  %764 = vmatpush3.xpose.msk.msra.mxu0 %vm365_vm1, %v361_v2  ;;  %v443_v7 = vand.u32 127, %v442_v6  ;;  %s542_s25 = scalar_lea.sflag [#allocation9], %s1224_s16  ;;  %p1358_p7 = scmp.ne.s32.totalorder %s1350_s6, 0 }
  0x5c   : > { %s748_s29 = sshll.u32 %s347_s15, 3  ;;  %769 = vmatpush3.msra.mxu1 %v362_v18  ;;  %s1264_s15 = scalar_lea.hbm %s1345_s5, %s755_s11 }
  0x5d   : > { %s359_s9 = scalar_lea.vmem %s1341_s1, %s748_s29  ;;  %s352_s27 = scalar_lea.vmem %s1340_s0, %s748_s29 }
  0x5e   : > { %v360_v3 = vld [vmem:[%s359_s9] sm:$0xff]  ;;  %s570_s29 = sshll.u32 %s345_s24, 4  ;;  %s1038_s13 = smov [#allocation8]   ;;  %s571_s29 = int_to_ptr.vmem [resolvable:$true] %s570_s29 }
  0x5f   : > { %v363_v4 = vld [vmem:[%s352_s27] sm:$0xff]  ;;  %v364_v5 = vmul.f32 0.17677669, %v360_v3  ;;  %s913_s14 = scalar_lea.vmem %s571_s29, 128  ;;  %s917_s9 = sshll.u32 %s1038_s13, 4  ;;  %s918_s9 = int_to_ptr.vmem [resolvable:$false] %s917_s9 }
  0x60   : > { %445 = vperm.xlu0 %848, %v363_v4   ;;  %p914_p5 = scmp.ne.s32.totalorder %s571_s29, %s913_s14  ;;  %s919_s30 = scalar_lea.vmem %s918_s9, 256 }
  0x61   : > { %766 = vmatmul.mubr.msk.f32.vlgmr.msra.gmra.mrb[0].mxu0 %vm365_vm1, %v364_v5  ;;  %p920_p12 = scmp.lt.s32.totalorder %s571_s29, %s918_s9  ;;  %p921_p1 = scmp.lt.s32.totalorder %s919_s30, %s913_s14 }
  0x62   : > { %p915_p4 = pnand %p914_p5, %p1358_p7 }
  0x63   : > { %p922_p2 = por %p921_p1, %p920_p12 }
  0x64   : > { %p916_p10 = pneg %p915_p4 }
  0x66   : > { %p923_p9 = pnand %p922_p2, %p916_p10 }
  0xdf   : > { %v446_v8 = vpop.permute.xlu0 %445 }
  0xe0   : > { %vm447_vm2 = vcmp.lt.s32.totalorder %v443_v7, %v446_v8 }
 0x134   : > { %v438_v9 = vpop.f32.mrb[0].mxu0 }
 0x135   : > { %v448_v10 = vsel %vm447_vm2, %v438_v9, -1000000.0  ;;  %v767_v11 = vpop.f32.mrb[1].mxu0 }
 0x136   : > { %v450_v12 = vsel %vm449_vm3, %v448_v10, -inf }
 0x137   : > { %451 = vmax.xlane.f32.xlu0 %v450_v12 }
 0x1c4   : > { %v452_v13 = vpop.xlane.xlu0 %451 }
 0x1c5   : > { %v453_v14 = vsub.f32 %v448_v10, %v452_v13 }
 0x1c7   : > { %v454_v15 = vmul.f32 1.442695, %v453_v14 }
 0x1c9   : > { %849 = vpow2.f32 %v454_v15 }
 0x1d3   : > { %v850_v16 = vpop.eup %849 }
 0x1d4   : > { %v456_v17 = vsel %vm449_vm3, %v850_v16, 0.0 }
 0x1d5   : > { %457 = vadd.xlane.f32.xlu1 %v456_v17 }
 0x262   : > { %v458_v19 = vpop.xlane.xlu1 %457 }
 0x263   : > { %851 = vrcp.f32 %v458_v19 }
 0x26d   : > { %v852_v20 = vpop.eup %851 }
 0x26e   : > { %v460_v21 = vmul.f32 %v852_v20, %v850_v16 }
 0x270   : > { %771 = vmatmul.mubr.msk.f32.vlgmr.msra.gmra.mrb[0].mxu1 %vm449_vm3, %v460_v21  ;;  %461 = vst.msk [vmem:[%s345_s24] sm:$0xff] %vm449_vm3, %v460_v21 }
 0x271   : > { %926 = shalt.err (!%p923_p9)
}
 0x272   : > { %s927_s10 = scalar_lea.hbm %s1264_s15, 128  ;;  %s931_s28 = scalar_lea.hbm %s1345_s5, 256 }
 0x273   : > { %p928_p11 = scmp.ne.s32.totalorder %s1264_s15, %s927_s10  ;;  %p932_p13 = scmp.lt.u32.totalorder %s1264_s15, %s1345_s5 }
 0x274   : > { %p933_p8 = scmp.lt.u32.totalorder %s931_s28, %s927_s10  ;;  %p935_p5 = scmp.lt.u32.totalorder %s927_s10, %s1264_s15 }
 0x275   : > { %p929_p3 = pnand %p928_p11, %p1358_p7 }
 0x276   : > { %p934_p0 = por %p933_p8, %p932_p13 }
 0x277   : > { %p930_p6 = pneg %p929_p3 }
 0x278   : > { %p936_p4 = por %p935_p5, %p934_p0 }
 0x27a   : > { %p937_p10 = pnand %p936_p4, %p930_p6 }
 0x27c   : > { %940 = shalt.err (!%p937_p10)
}
 0x27d   : > { %778 = dma.vmem_to_hbm [thread:$0]  (%p1358_p7), %s571_s29, 128, %s1264_s15, %s542_s25  }
 0x27e   : > { %s338_s14 = scalar_lea.vmem [#allocation7], %s1227_s12  ;;  %s1290_s24 = scalar_lea.hbm %s1344_s4, %s755_s11 }
 0x27f   : > { %s556_s9 = sshll.u32 %s338_s14, 4  ;;  %s537_s10 = scalar_lea.sflag [#allocation4], %s1224_s16  ;;  %s1292_s9 = int_to_ptr.vmem [resolvable:$true] %s556_s9 }
 0x280   : > { %s941_s28 = scalar_lea.vmem %s1292_s9, 128  ;;  %s1039_s21 = smov [#allocation7]  }
 0x281   : > { %p942_p12 = scmp.ne.s32.totalorder %s1292_s9, %s941_s28  ;;  %s945_s12 = sshll.u32 %s1039_s21, 4  ;;  %s946_s12 = int_to_ptr.vmem [resolvable:$false] %s945_s12 }
 0x282   : > { %s947_s11 = scalar_lea.vmem %s946_s12, 256  ;;  %p948_p9 = scmp.lt.s32.totalorder %s1292_s9, %s946_s12 }
 0x283   : > { %p943_p1 = pnand %p942_p12, %p1358_p7  ;;  %p949_p11 = scmp.lt.s32.totalorder %s947_s11, %s941_s28 }
 0x285   : > { %p944_p2 = pneg %p943_p1  ;;  %p950_p3 = por %p949_p11, %p948_p9 }
 0x287   : > { %p951_p6 = pnand %p950_p3, %p944_p2 }
 0x343   : > { %v531_v22 = vpop.f32.mrb[0].mxu1 }
 0x344   : > { %535 = vst.msk [vmem:[%s338_s14] sm:$0xff] %vm365_vm1, %v531_v22  ;;  %v772_v23 = vpop.f32.mrb[1].mxu1 }
 0x345   : > { %954 = shalt.err (!%p951_p6)
}
 0x346   : > { %s955_s16 = scalar_lea.hbm %s1290_s24, 128  ;;  %s959_s25 = scalar_lea.hbm %s1344_s4, 256 }
 0x347   : > { %p956_p13 = scmp.ne.s32.totalorder %s1290_s24, %s955_s16  ;;  %p960_p5 = scmp.lt.u32.totalorder %s1290_s24, %s1344_s4 }
 0x348   : > { %p961_p4 = scmp.lt.u32.totalorder %s959_s25, %s955_s16  ;;  %p963_p12 = scmp.lt.u32.totalorder %s955_s16, %s1290_s24 }
 0x349   : > { %p957_p8 = pnand %p956_p13, %p1358_p7 }
 0x34a   : > { %p962_p10 = por %p961_p4, %p960_p5 }
 0x34b   : > { %p958_p0 = pneg %p957_p8 }
 0x34c   : > { %p964_p1 = por %p963_p12, %p962_p10 }
 0x34e   : > { %p965_p2 = pnand %p964_p1, %p958_p0 }
 0x350   : > { %968 = shalt.err (!%p965_p2)
}
 0x351   : > { %777 = dma.vmem_to_hbm [thread:$0]  (%p1358_p7), %s1292_s9, 128, %s1290_s24, %s537_s10  }
 0x352 PF: > { %s582_s14 = sand.u32 1, %s1011_s18   ;;  %p1359_p9 = scmp.ne.s32.totalorder %s1351_s8, 0 }
 0x353   : > { %p1360_p11 = scmp.ge.s32.totalorder %s1031_s23, 2  ;;  %s583_s30 = scalar_lea.sflag [#allocation4], %s582_s14 }
 0x355   : > { %p789_p3 = pnand %p1360_p11, %p1359_p9 }
 0x357   : > { %1002 = dma.done.wait (!%p789_p3), %s583_s30, 128  }
 0x358   : > { %1004 = vsyncadd (!%p789_p3), %s583_s30, 4294967168  ;;  %s592_s27 = scalar_lea.sflag [#allocation9], %s582_s14 }
 0x359   : > { %1006 = dma.done.wait (!%p789_p3), %s592_s27, 128  }
 0x35a   : > { %1008 = vsyncadd (!%p789_p3), %s592_s27, 4294967168  ;;  %s28_s23 = sadd.s32 1, %s1031_s23   ;;  %s1361_s18 = smov %s1015_s19 }
 0x35b   : > { %p25_p6 = scmp.ge.s32.totalorder %s28_s23, 4   ;;  %s1362_s19 = smov %s1019_s20 }
 0x35c   : > { %s1363_s20 = smov %s1126_s7  ;;  %s1364_s21 = smov %s1027_s22 }
 0x35d   : > { %s1365_s22 = smov %s1367_s26  ;;  %27 = sbr.rel (!%p25_p6) target bundleno = 10 (0xa), region = 117 }
 0x364   :  { %597 = vsyncpa [#allocation3], 1 }
 0x365   :  { %599 = vsyncpa [#allocation3 + $0x1], 1 }
 0x366   :  { %600 = vsyncpa [#allocation6], 1 }
 0x367   :  { %602 = vsyncpa [#allocation6 + $0x1], 1 }
 0x368   :  { %603 = vsyncpa [#allocation4], 1 }
 0x369   :  { %605 = vsyncpa [#allocation4 + $0x1], 1 }
 0x36a   :  { %606 = vsyncpa [#allocation9], 1 }
 0x36b   :  { %608 = vsyncpa [#allocation9 + $0x1], 1 }

</bundles_post_ra>
